<compile_context>
chip_gen: v6e
topology: v6e:2x2x1
jax: 0.10.0
libtpu: 0.0.40
codegen_flags: <defaults>
</compile_context>

<pallas_src>
import math

import jax
import jax.numpy as jnp
from jax.experimental import pallas as pl
from jax.experimental.pallas import tpu as pltpu


# ----------------------------------------------------------------------------
# Tiling / padding helpers
# ----------------------------------------------------------------------------
_ROW_TILE = 512   # adjacency row/col tile (bf16 512x512 tile = 512 KiB)
_COL_TILE = 512   # output-column tile for wide decoder outputs


def _round_up(x, m):
    return ((x + m - 1) // m) * m


def _tile_and_pad(n, pref):
    """Tile size and padded extent for a dimension of size n."""
    if n <= pref:
        return n, n                      # block == full dim (no (8,128) issue)
    return pref, _round_up(n, pref)


def _pad2d(x, rows, cols, dtype=None):
    if dtype is not None and x.dtype != dtype:
        x = x.astype(dtype)
    r, c = x.shape
    if r == rows and c == cols:
        return x
    return jnp.pad(x, ((0, rows - r), (0, cols - c)))


# ----------------------------------------------------------------------------
# Kernel 1: adjacency propagation   out = A @ X
#   A: bf16 tiles, X: bf16 tiles, f32 accumulation directly in the output block
# ----------------------------------------------------------------------------
def _prop_kernel(a_ref, x_ref, o_ref):
    @pl.when(pl.program_id(2) == 0)
    def _():
        o_ref[...] = jnp.zeros_like(o_ref)

    o_ref[...] += jnp.dot(a_ref[...], x_ref[...],
                          preferred_element_type=jnp.float32)


def adj_propagate(a_pad, x, n_rows):
    """out = A @ x.  a_pad: (np,np) bf16 (pre-padded); x: (n, w) f32."""
    np_ = a_pad.shape[0]
    tm = tk = np_ if np_ <= _ROW_TILE else _ROW_TILE
    w = x.shape[1]
    tn, wp = _tile_and_pad(w, _COL_TILE)
    xb = _pad2d(x, np_, wp, jnp.bfloat16)
    grid = (np_ // tm, wp // tn, np_ // tk)

    flops = 2 * np_ * np_ * wp
    bytes_acc = 2 * np_ * np_ * (wp // tn) + 2 * np_ * wp * (np_ // tm) + 4 * np_ * wp
    out = pl.pallas_call(
        _prop_kernel,
        out_shape=jax.ShapeDtypeStruct((np_, wp), jnp.float32),
        grid=grid,
        in_specs=[
            pl.BlockSpec((tm, tk), lambda i, j, k: (i, k)),
            pl.BlockSpec((tk, tn), lambda i, j, k: (k, j)),
        ],
        out_specs=pl.BlockSpec((tm, tn), lambda i, j, k: (i, j)),
        compiler_params=pltpu.CompilerParams(
            dimension_semantics=("parallel", "parallel", "arbitrary")),
        cost_estimate=pl.CostEstimate(flops=int(flops), transcendentals=0,
                                      bytes_accessed=int(bytes_acc)),
    )(a_pad, xb)
    return out[:n_rows, :w]


# ----------------------------------------------------------------------------
# Kernel 2: dual-graph propagation   out = (wa*A_sp + wb*A_ft) @ X
# ----------------------------------------------------------------------------
def _dual_prop_kernel(s_ref, asp_ref, aft_ref, x_ref, o_ref):
    @pl.when(pl.program_id(2) == 0)
    def _():
        o_ref[...] = jnp.zeros_like(o_ref)

    wa = s_ref[0, 0]
    wb = s_ref[0, 1]
    a_blend = (wa * asp_ref[...].astype(jnp.float32)
               + wb * aft_ref[...].astype(jnp.float32)).astype(jnp.bfloat16)
    o_ref[...] += jnp.dot(a_blend, x_ref[...],
                          preferred_element_type=jnp.float32)


def dual_adj_propagate(a_sp_pad, a_ft_pad, x, w_sp, w_ft, n_rows):
    """out = (w_sp*A_sp + w_ft*A_ft) @ x."""
    np_ = a_sp_pad.shape[0]
    tm = tk = np_ if np_ <= _ROW_TILE else _ROW_TILE
    w = x.shape[1]
    tn, wp = _tile_and_pad(w, _COL_TILE)
    xb = _pad2d(x, np_, wp, jnp.bfloat16)
    grid = (np_ // tm, wp // tn, np_ // tk)
    scal = jnp.stack([jnp.asarray(w_sp, jnp.float32),
                      jnp.asarray(w_ft, jnp.float32)]).reshape(1, 2)

    flops = 2 * np_ * np_ * wp + 3 * np_ * np_
    bytes_acc = 2 * 2 * np_ * np_ * (wp // tn) + 2 * np_ * wp * (np_ // tm) + 4 * np_ * wp
    out = pl.pallas_call(
        _dual_prop_kernel,
        out_shape=jax.ShapeDtypeStruct((np_, wp), jnp.float32),
        grid=grid,
        in_specs=[
            pl.BlockSpec((1, 2), lambda i, j, k: (0, 0),
                         memory_space=pltpu.MemorySpace.SMEM),
            pl.BlockSpec((tm, tk), lambda i, j, k: (i, k)),
            pl.BlockSpec((tm, tk), lambda i, j, k: (i, k)),
            pl.BlockSpec((tk, tn), lambda i, j, k: (k, j)),
        ],
        out_specs=pl.BlockSpec((tm, tn), lambda i, j, k: (i, j)),
        compiler_params=pltpu.CompilerParams(
            dimension_semantics=("parallel", "parallel", "arbitrary")),
        cost_estimate=pl.CostEstimate(flops=int(flops), transcendentals=0,
                                      bytes_accessed=int(bytes_acc)),
    )(scal, a_sp_pad, a_ft_pad, xb)
    return out[:n_rows, :w]


# ----------------------------------------------------------------------------
# Kernel 3: fused VAE tail
#   combined = (e1+e2)/2 ; mu = e@Wmu+b ; lv = e@Wlv+b ; z = mu + eps*exp(lv/2)
#   (both modalities, separate vreg-aligned head matmuls, one row-tiled kernel)
# ----------------------------------------------------------------------------
def _tail_kernel(e1_ref, e2_ref, eps1_ref, eps2_ref,
                 wmu1_ref, bmu1_ref, wlv1_ref, blv1_ref,
                 wmu2_ref, bmu2_ref, wlv2_ref, blv2_ref,
                 comb_ref, mu1_ref, lv1_ref, mu2_ref, lv2_ref, z1_ref, z2_ref):
    e1 = e1_ref[...]
    e2 = e2_ref[...]
    comb_ref[...] = 0.5 * (e1 + e2)

    mu1 = jnp.dot(e1, wmu1_ref[...], preferred_element_type=jnp.float32) + bmu1_ref[...]
    lv1 = jnp.dot(e1, wlv1_ref[...], preferred_element_type=jnp.float32) + blv1_ref[...]
    mu2 = jnp.dot(e2, wmu2_ref[...], preferred_element_type=jnp.float32) + bmu2_ref[...]
    lv2 = jnp.dot(e2, wlv2_ref[...], preferred_element_type=jnp.float32) + blv2_ref[...]

    mu1_ref[...] = mu1
    lv1_ref[...] = lv1
    mu2_ref[...] = mu2
    lv2_ref[...] = lv2
    z1_ref[...] = mu1 + eps1_ref[...] * jnp.exp(0.5 * lv1)
    z2_ref[...] = mu2 + eps2_ref[...] * jnp.exp(0.5 * lv2)


def vae_tail(e1, e2, eps1, eps2,
             wmu1, bmu1, wlv1, blv1, wmu2, bmu2, wlv2, blv2):
    n, d1 = e1.shape
    d2 = e2.shape[1]
    tm, np_ = _tile_and_pad(n, _ROW_TILE)
    pad = lambda x: _pad2d(x, np_, x.shape[1])
    e1p, e2p, eps1p, eps2p = pad(e1), pad(e2), pad(eps1), pad(eps2)

    row = lambda i: (i, 0)
    rep = lambda i: (0, 0)
    outs = pl.pallas_call(
        _tail_kernel,
        out_shape=(
            jax.ShapeDtypeStruct((np_, d1), jnp.float32),   # combined
            jax.ShapeDtypeStruct((np_, d1), jnp.float32),   # mu1
            jax.ShapeDtypeStruct((np_, d1), jnp.float32),   # log_var1
            jax.ShapeDtypeStruct((np_, d2), jnp.float32),   # mu2
            jax.ShapeDtypeStruct((np_, d2), jnp.float32),   # log_var2
            jax.ShapeDtypeStruct((np_, d1), jnp.float32),   # z1
            jax.ShapeDtypeStruct((np_, d2), jnp.float32),   # z2
        ),
        grid=(np_ // tm,),
        in_specs=[
            pl.BlockSpec((tm, d1), row),
            pl.BlockSpec((tm, d2), row),
            pl.BlockSpec((tm, d1), row),
            pl.BlockSpec((tm, d2), row),
            pl.BlockSpec((d1, d1), rep),
            pl.BlockSpec((1, d1), rep),
            pl.BlockSpec((d1, d1), rep),
            pl.BlockSpec((1, d1), rep),
            pl.BlockSpec((d2, d2), rep),
            pl.BlockSpec((1, d2), rep),
            pl.BlockSpec((d2, d2), rep),
            pl.BlockSpec((1, d2), rep),
        ],
        out_specs=(
            pl.BlockSpec((tm, d1), row),
            pl.BlockSpec((tm, d1), row),
            pl.BlockSpec((tm, d1), row),
            pl.BlockSpec((tm, d2), row),
            pl.BlockSpec((tm, d2), row),
            pl.BlockSpec((tm, d1), row),
            pl.BlockSpec((tm, d2), row),
        ),
        compiler_params=pltpu.CompilerParams(dimension_semantics=("parallel",)),
        cost_estimate=pl.CostEstimate(
            flops=int(2 * np_ * (d1 * d1 + d2 * d2) * 2 + 16 * np_ * (d1 + d2)),
            transcendentals=int(np_ * (d1 + d2)),
            bytes_accessed=int(4 * (10 * np_ * (d1 + d2) + 2 * d1 * d1 + 2 * d2 * d2))),
    )(e1p, e2p, eps1p, eps2p,
      wmu1, bmu1.reshape(1, -1), wlv1, blv1.reshape(1, -1),
      wmu2, bmu2.reshape(1, -1), wlv2, blv2.reshape(1, -1))

    return tuple(o[:n] for o in outs)


# ----------------------------------------------------------------------------
# Parameter construction (mirrors PyTorch __init__/reset_parameters)
# ----------------------------------------------------------------------------
def _xavier_uniform(key, fan_in, fan_out):
    limit = math.sqrt(6.0 / (fan_in + fan_out))
    return jax.random.uniform(key, (fan_in, fan_out), jnp.float32, -limit, limit)


def _linear_params(key, fan_in, fan_out):
    kw, kb = jax.random.split(key)
    bound = 1.0 / math.sqrt(fan_in)
    w = jax.random.uniform(kw, (fan_in, fan_out), jnp.float32, -bound, bound)
    b = jax.random.uniform(kb, (fan_out,), jnp.float32, -bound, bound)
    return w, b


def init_params(key, dim_in1, dim_out1, dim_in2, dim_out2):
    keys = jax.random.split(key, 8)
    mu1_w, mu1_b = _linear_params(keys[4], dim_out1, dim_out1)
    lv1_w, lv1_b = _linear_params(keys[5], dim_out1, dim_out1)
    mu2_w, mu2_b = _linear_params(keys[6], dim_out2, dim_out2)
    lv2_w, lv2_b = _linear_params(keys[7], dim_out2, dim_out2)
    return {
        "enc1_w": _xavier_uniform(keys[0], dim_in1, dim_out1),
        "dec1_w": _xavier_uniform(keys[1], dim_out1, dim_in1),
        "enc2_w": _xavier_uniform(keys[2], dim_in2, dim_out2),
        "dec2_w": _xavier_uniform(keys[3], dim_out2, dim_in2),
        "w_spatial_omics1": jnp.float32(0.5),
        "w_spatial_omics2": jnp.float32(0.5),
        "w_feature_omics1": jnp.float32(0.5),
        "w_feature_omics2": jnp.float32(0.5),
        "mu1_w": mu1_w, "mu1_b": mu1_b, "lv1_w": lv1_w, "lv1_b": lv1_b,
        "mu2_w": mu2_w, "mu2_b": mu2_b, "lv2_w": lv2_w, "lv2_b": lv2_b,
    }


# ----------------------------------------------------------------------------
# Forward pass (Encoder_overall.forward with default ablation flags)
# ----------------------------------------------------------------------------
def encoder_overall_forward(params, feat1, feat2,
                            adj_sp1, adj_ft1, adj_sp2, adj_ft2, eps1, eps2):
    n = feat1.shape[0]
    f1 = params["enc1_w"].shape[0]
    f2 = params["enc2_w"].shape[0]

    # Adjacency: pad once (zero pad is inert) and store bf16 in HBM.
    _, np_ = _tile_and_pad(n, _ROW_TILE)
    asp1 = _pad2d(adj_sp1, np_, np_, jnp.bfloat16)
    aft1 = _pad2d(adj_ft1, np_, np_, jnp.bfloat16)
    asp2 = _pad2d(adj_sp2, np_, np_, jnp.bfloat16)
    aft2 = _pad2d(adj_ft2, np_, np_, jnp.bfloat16)

    # X@W hoisted out of the N^2 reduction: computed exactly once (tiny dots).
    xw1 = jnp.dot(feat1, params["enc1_w"])
    xw2 = jnp.dot(feat2, params["enc2_w"])

    # Fused dual-graph GCN encoders: (wa*A_sp + wb*A_ft) @ XW (one N^2 pass each).
    e1 = dual_adj_propagate(asp1, aft1, xw1,
                            params["w_spatial_omics1"], params["w_feature_omics1"], n)
    e2 = dual_adj_propagate(asp2, aft2, xw2,
                            params["w_spatial_omics2"], params["w_feature_omics2"], n)

    # Fused VAE tail: combine + mu/log_var heads + reparameterization.
    combined, mu1, lv1, mu2, lv2, z1, z2 = vae_tail(
        e1, e2, eps1, eps2,
        params["mu1_w"], params["mu1_b"], params["lv1_w"], params["lv1_b"],
        params["mu2_w"], params["mu2_b"], params["lv2_w"], params["lv2_b"])

    # Cross-modality reconstruction reassociation:
    #   enc(dec(z)) == A @ ((A @ (z @ Wd)) @ We) == A @ (A @ (z @ (Wd @ We)))
    m1 = jnp.dot(params["dec2_w"], params["enc2_w"])   # (D, D), for z1 cross
    m2 = jnp.dot(params["dec1_w"], params["enc1_w"])   # (D, D), for z2 cross

    # Fuse passes that read the same adjacency (recon + cross-inner share A).
    rhs_a = jnp.concatenate([jnp.dot(combined, params["dec1_w"]),
                             jnp.dot(z2, m2)], axis=1)          # width f1 + D
    rhs_b = jnp.concatenate([jnp.dot(combined, params["dec2_w"]),
                             jnp.dot(z1, m1)], axis=1)          # width f2 + D
    out_a = adj_propagate(asp1, rhs_a, n)      # A_sp1 @ [comb@Wd1 | z2@m2]
    out_b = adj_propagate(asp2, rhs_b, n)      # A_sp2 @ [comb@Wd2 | z1@m1]
    recon1, t2 = out_a[:, :f1], out_a[:, f1:]
    recon2, t1 = out_b[:, :f2], out_b[:, f2:]

    cross2 = adj_propagate(asp1, t2, n)        # enc1(dec1(z2, A_sp1), A_sp1)
    cross1 = adj_propagate(asp2, t1, n)        # enc2(dec2(z1, A_sp2), A_sp2)

    return {
        "emb_latent_omics1": z1,
        "emb_latent_omics2": z2,
        "emb_latent_combined": combined,
        "emb_recon_omics1": recon1,
        "emb_recon_omics2": recon2,
        "emb_latent_omics1_across_recon": cross1,
        "emb_latent_omics2_across_recon": cross2,
        "alpha": None,                         # use_attention=False
        "mu_omics1": mu1, "log_var_omics1": lv1,
        "mu_omics2": mu2, "log_var_omics2": lv2,
    }


# ----------------------------------------------------------------------------
# Pure-JAX f32 reference following the original PyTorch computation order
# ----------------------------------------------------------------------------
def _reference(params, feat1, feat2, adj_sp1, adj_ft1, adj_sp2, adj_ft2, eps1, eps2):
    g = lambda x, w, a: a @ (x @ w)
    e1 = (params["w_spatial_omics1"] * g(feat1, params["enc1_w"], adj_sp1)
          + params["w_feature_omics1"] * g(feat1, params["enc1_w"], adj_ft1))
    e2 = (params["w_spatial_omics2"] * g(feat2, params["enc2_w"], adj_sp2)
          + params["w_feature_omics2"] * g(feat2, params["enc2_w"], adj_ft2))
    comb = (e1 + e2) / 2.0
    mu1 = e1 @ params["mu1_w"] + params["mu1_b"]
    lv1 = e1 @ params["lv1_w"] + params["lv1_b"]
    mu2 = e2 @ params["mu2_w"] + params["mu2_b"]
    lv2 = e2 @ params["lv2_w"] + params["lv2_b"]
    z1 = mu1 + eps1 * jnp.exp(0.5 * lv1)
    z2 = mu2 + eps2 * jnp.exp(0.5 * lv2)
    return {
        "emb_latent_omics1": z1,
        "emb_latent_omics2": z2,
        "emb_latent_combined": comb,
        "emb_recon_omics1": g(comb, params["dec1_w"], adj_sp1),
        "emb_recon_omics2": g(comb, params["dec2_w"], adj_sp2),
        "emb_latent_omics1_across_recon": g(g(z1, params["dec2_w"], adj_sp2),
                                            params["enc2_w"], adj_sp2),
        "emb_latent_omics2_across_recon": g(g(z2, params["dec1_w"], adj_sp1),
                                            params["enc1_w"], adj_sp1),
        "mu_omics1": mu1, "log_var_omics1": lv1,
        "mu_omics2": mu2, "log_var_omics2": lv2,
    }


# ----------------------------------------------------------------------------
if __name__ == "__main__":
    N = 16          # graph nodes / spots
    DIM_IN1 = 32    # omics1 input features
    DIM_IN2 = 24    # omics2 input features
    DIM_OUT = 16    # latent dim (out_omics1 == out_omics2, required by the module)

    root = jax.random.PRNGKey(0)
    k_param, k_f1, k_f2, k_a1, k_a2, k_a3, k_a4, k_e1, k_e2 = jax.random.split(root, 9)

    params = init_params(k_param, DIM_IN1, DIM_OUT, DIM_IN2, DIM_OUT)

    feat1 = jax.random.normal(k_f1, (N, DIM_IN1), jnp.float32)
    feat2 = jax.random.normal(k_f2, (N, DIM_IN2), jnp.float32)

    def make_adj(key):
        a = jax.random.uniform(key, (N, N), jnp.float32)
        a = (a > 0.7).astype(jnp.float32) + jnp.eye(N, dtype=jnp.float32)
        return a / jnp.sum(a, axis=1, keepdims=True)   # row-normalized dense adjacency

    adj_sp1, adj_ft1, adj_sp2, adj_ft2 = (make_adj(k) for k in (k_a1, k_a2, k_a3, k_a4))

    # torch.randn_like(std) equivalent, deterministic via explicit keys.
    eps1 = jax.random.normal(k_e1, (N, DIM_OUT), jnp.float32)
    eps2 = jax.random.normal(k_e2, (N, DIM_OUT), jnp.float32)

    out = encoder_overall_forward(
        params, feat1, feat2, adj_sp1, adj_ft1, adj_sp2, adj_ft2, eps1, eps2)
    jax.block_until_ready(out)

    ref = _reference(params, feat1, feat2, adj_sp1, adj_ft1, adj_sp2, adj_ft2, eps1, eps2)
    for name, r in ref.items():
        assert jnp.allclose(out[name], r, rtol=2e-2, atol=2e-2), name

    print("KERNEL_OK")
</pallas_src>

<mosaic_0001>
module attributes {stable_mosaic.version = 11 : i64} {
  func.func @_dual_prop_kernel(%arg0: i32, %arg1: i32, %arg2: i32, %arg3: memref<1x2xf32, #tpu.memory_space<smem>>, %arg4: memref<16x16xbf16, #tpu.memory_space<vmem>>, %arg5: memref<16x16xbf16, #tpu.memory_space<vmem>>, %arg6: memref<16x16xbf16, #tpu.memory_space<vmem>>, %arg7: memref<16x16xf32, #tpu.memory_space<vmem>>) attributes {dimension_semantics = [#tpu.dimension_semantics<parallel>, #tpu.dimension_semantics<parallel>, #tpu.dimension_semantics<arbitrary>], iteration_bounds = array<i64: 1, 1, 1>, scalar_prefetch = 0 : i64, scratch_operands = 0 : i64, tpu.core_type = #tpu.core_type<tc>, window_params = [{transform_indices = @transform_0, window_bounds = array<i64: 1, 2>}, {transform_indices = @transform_1, window_bounds = array<i64: 16, 16>}, {transform_indices = @transform_2, window_bounds = array<i64: 16, 16>}, {transform_indices = @transform_3, window_bounds = array<i64: 16, 16>}, {transform_indices = @transform_4, window_bounds = array<i64: 16, 16>}]} {
    %c0_i32 = arith.constant 0 : i32
    %0 = arith.cmpi eq, %arg2, %c0_i32 : i32
    %1 = arith.extui %0 : i1 to i32
    %c0_i32_0 = arith.constant 0 : i32
    %2 = arith.cmpi ne, %1, %c0_i32_0 : i32
    scf.if %2 {
      %cst_13 = arith.constant 0.000000e+00 : f32
      %20 = vector.broadcast %cst_13 : f32 to vector<16x16xf32>
      %c0_14 = arith.constant 0 : index
      %c0_15 = arith.constant 0 : index
      %21 = vector.load %arg7[%c0_14, %c0_15] : memref<16x16xf32, #tpu.memory_space<vmem>>, vector<16x16xf32>
      tpu.vector_store %arg7[%c0_14, %c0_15], %20 {strides = array<i32>} : memref<16x16xf32, #tpu.memory_space<vmem>>, vector<16x16xf32>,
    } else {
    }
    %c0 = arith.constant 0 : index
    %c0_1 = arith.constant 0 : index
    %3 = memref.load %arg3[%c0, %c0_1] : memref<1x2xf32, #tpu.memory_space<smem>>
    %c0_2 = arith.constant 0 : index
    %c1 = arith.constant 1 : index
    %4 = memref.load %arg3[%c0_2, %c1] : memref<1x2xf32, #tpu.memory_space<smem>>
    %c0_3 = arith.constant 0 : index
    %c0_4 = arith.constant 0 : index
    %5 = vector.load %arg4[%c0_3, %c0_4] : memref<16x16xbf16, #tpu.memory_space<vmem>>, vector<16x16xbf16>
    %6 = arith.extf %5 : vector<16x16xbf16> to vector<16x16xf32>
    %7 = vector.broadcast %3 : f32 to vector<16x16xf32>
    %8 = arith.mulf %7, %6 : vector<16x16xf32>
    %c0_5 = arith.constant 0 : index
    %c0_6 = arith.constant 0 : index
    %9 = vector.load %arg5[%c0_5, %c0_6] : memref<16x16xbf16, #tpu.memory_space<vmem>>, vector<16x16xbf16>
    %10 = arith.extf %9 : vector<16x16xbf16> to vector<16x16xf32>
    %11 = vector.broadcast %4 : f32 to vector<16x16xf32>
    %12 = arith.mulf %11, %10 : vector<16x16xf32>
    %13 = arith.addf %8, %12 : vector<16x16xf32>
    %14 = arith.truncf %13 : vector<16x16xf32> to vector<16x16xbf16>
    %c0_7 = arith.constant 0 : index
    %c0_8 = arith.constant 0 : index
    %15 = vector.load %arg7[%c0_7, %c0_8] : memref<16x16xf32, #tpu.memory_space<vmem>>, vector<16x16xf32>
    %c0_9 = arith.constant 0 : index
    %c0_10 = arith.constant 0 : index
    %16 = vector.load %arg6[%c0_9, %c0_10] : memref<16x16xbf16, #tpu.memory_space<vmem>>, vector<16x16xbf16>
    %cst = arith.constant dense<0.000000e+00> : vector<16x16xf32>
    %17 = tpu.matmul %14, %16, %cst {dimension_numbers = #tpu.dot_dimension_numbers<[1], [0], [0], [1], [0, 0, 1, 1], [], []>} : vector<16x16xbf16>, vector<16x16xbf16>, vector<16x16xf32> -> vector<16x16xf32>
    %18 = arith.addf %15, %17 : vector<16x16xf32>
    %c0_11 = arith.constant 0 : index
    %c0_12 = arith.constant 0 : index
    %19 = vector.load %arg7[%c0_11, %c0_12] : memref<16x16xf32, #tpu.memory_space<vmem>>, vector<16x16xf32>
    tpu.vector_store %arg7[%c0_11, %c0_12], %18 {strides = array<i32>} : memref<16x16xf32, #tpu.memory_space<vmem>>, vector<16x16xf32>,
    return
  }
  func.func @transform_0(%arg0: i32, %arg1: i32, %arg2: i32) -> (i32, i32) {
    %c0_i32 = arith.constant 0 : i32
    %c0_i32_0 = arith.constant 0 : i32
    %c0_i32_1 = arith.constant 0 : i32
    return %c0_i32, %c0_i32_0 : i32, i32
  }
  func.func @transform_1(%arg0: i32, %arg1: i32, %arg2: i32) -> (i32, i32) {
    %c0_i32 = arith.constant 0 : i32
    return %arg0, %arg2 : i32, i32
  }
  func.func @transform_2(%arg0: i32, %arg1: i32, %arg2: i32) -> (i32, i32) {
    %c0_i32 = arith.constant 0 : i32
    return %arg0, %arg2 : i32, i32
  }
  func.func @transform_3(%arg0: i32, %arg1: i32, %arg2: i32) -> (i32, i32) {
    %c0_i32 = arith.constant 0 : i32
    return %arg2, %arg1 : i32, i32
  }
  func.func @transform_4(%arg0: i32, %arg1: i32, %arg2: i32) -> (i32, i32) {
    %c0_i32 = arith.constant 0 : i32
    return %arg0, %arg1 : i32, i32
  }
}

</mosaic_0001>

<bundles_post_ra>
// kernel: tpu_custom_call.1
= control target key start
LH: loop header
LB: loop body
LE: loop exit
PB: predicated region body
PF: predicated region fallthrough
CT: control target
= control target key end

     0   :  { %9 = vsyncpa [#allocation5], 0  ;;  %s358_s0 = inlined_call_operand.hbm [shape: f32[1,2], index: 0, kind: input, shape index: {}]   ;;  %s359_s1 = inlined_call_operand.hbm [shape: bf16[16,16], index: 1, kind: input, shape index: {}]   ;;  %s360_s2 = inlined_call_operand.hbm [shape: bf16[16,16], index: 2, kind: input, shape index: {}]   ;;  %s361_s3 = inlined_call_operand.hbm [shape: bf16[16,16], index: 3, kind: input, shape index: {}]   ;;  %s362_s4 = inlined_call_operand.hbm [shape: f32[16,16], index: 4, kind: output, shape index: {}]  }
   0x1   :  { %10 = vsyncpa [#allocation3], 0 }
   0x2   :  { %11 = vsyncpa [#allocation8], 0 }
   0x3   :  { %12 = vsyncpa [#allocation4], 0  ;;  %s302_s15 = smov [#allocation7]   ;;  %s303_s17 = smov [#allocation6]  }
   0x4   :  { %s38_s16 = sshll.u32 %s302_s15, 4  ;;  %s26_s18 = sshll.u32 %s303_s17, 4  ;;  %s39_s16 = int_to_ptr.vmem [resolvable:$true] %s38_s16  ;;  %s27_s18 = int_to_ptr.vmem [resolvable:$true] %s26_s18 }
   0x5   :  { %s214_s19 = scalar_lea.vmem %s39_s16, 128  ;;  %p219_p1 = scmp.lt.s32.totalorder %s39_s16, %s39_s16 }
   0x6   :  { %p215_p0 = scmp.ne.s32.totalorder %s39_s16, %s214_s19  ;;  %p220_p2 = scmp.lt.s32.totalorder %s214_s19, %s214_s19 }
   0x8   :  { %p221_p3 = por %p220_p2, %p219_p1 }
   0xa   :  { %p222_p4 = pnand %p221_p3, %p215_p0 }
   0xc   :  { %225 = shalt.err (!%p222_p4)
}
   0xd   :  { %s304_s20 = smov 64   ;;  %s305_s21 = smov 4  }
   0xe   :  { %44 = dma.hbm_to_vmem [thread:$0]  %s360_s2, 128, %s39_s16, [#allocation8], %s304_s20, %s304_s20, %s305_s21  }
   0xf   :  { %s306_s24 = smov [#allocation2]   ;;  %s242_s27 = scalar_lea.vmem %s27_s18, 128 }
  0x10   :  { %20 = dma.hbm_to_smem %s358_s0, 16, %s306_s24, [#allocation5]  }
  0x11   :  { %p243_p5 = scmp.ne.s32.totalorder %s27_s18, %s242_s27  ;;  %p247_p6 = scmp.lt.s32.totalorder %s27_s18, %s27_s18 }
  0x12   :  { %p248_p7 = scmp.lt.s32.totalorder %s242_s27, %s242_s27 }
  0x14   :  { %p249_p8 = por %p248_p7, %p247_p6 }
  0x16   :  { %p250_p9 = pnand %p249_p8, %p243_p5 }
  0x18   :  { %253 = shalt.err (!%p250_p9)
}
  0x19   :  { %32 = dma.hbm_to_vmem [thread:$0]  %s359_s1, 128, %s27_s18, [#allocation3], %s304_s20, %s304_s20, %s305_s21  }
  0x1a   :  { %s307_s30 = smov [#allocation9]  }
  0x1b   :  { %s50_s5 = sshll.u32 %s307_s30, 4  ;;  %s51_s5 = int_to_ptr.vmem [resolvable:$true] %s50_s5 }
  0x1c   :  { %s262_s2 = scalar_lea.vmem %s51_s5, 128  ;;  %p267_p11 = scmp.lt.s32.totalorder %s51_s5, %s51_s5 }
  0x1d   :  { %p263_p10 = scmp.ne.s32.totalorder %s51_s5, %s262_s2  ;;  %p268_p12 = scmp.lt.s32.totalorder %s262_s2, %s262_s2 }
  0x1f   :  { %p269_p13 = por %p268_p12, %p267_p11 }
  0x21   :  { %p270_p0 = pnand %p269_p13, %p263_p10 }
  0x23   :  { %273 = shalt.err (!%p270_p0)
}
  0x24   :  { %56 = dma.hbm_to_vmem [thread:$0]  %s361_s3, 128, %s51_s5, [#allocation8], %s304_s20, %s304_s20, %s305_s21  }
  0x25   :  { %294 = dma.done.wait [#allocation5], 16  }
  0x26   :  { %295 = vsyncadd [#allocation5], 4294967280 }
  0x27   :  { %296 = dma.done.wait [#allocation3], 128  }
  0x28   :  { %297 = vsyncadd [#allocation3], 4294967168 }
  0x29   :  { %298 = dma.done.wait [#allocation8], 256  }
  0x2a   :  { %299 = vsyncadd [#allocation8], 4294967040 }
  0x2b   :  { %69 = sfence }
  0x2c   :  { %v205_v0 = vld [vmem:[#allocation9] sm:$0xff]   ;;  %v308_v1 = vmov 0.0   ;;  %vm75_vm0 = vcmask 130048   ;;  %s78_s1 = sld [smem:[#allocation2]]  ;;  %v179_v2 = vld [vmem:[#allocation6] sm:$0xff]   ;;  %vm309_vm1 = vmmov 0  }
  0x2d   :  { %188 = vmatprep.subr.bf16.mxu0 %v308_v1  ;;  %190 = vmatprep.mubr.msk.bf16.mxu0 %vm309_vm1, %v308_v1  ;;  %s175_s7 = sld [smem:[#allocation2 + $0x1]]  ;;  %v183_v3 = vld [vmem:[#allocation7] sm:$0xff]   ;;  %76 = vst.msk [vmem:[#allocation10] sm:$0xff] %vm75_vm0, %v308_v1  ;;  %77 = vst.msk [vmem:[#allocation10 + $0x8] sm:$0xff] %vm75_vm0, %v308_v1  ;;  %v180_v4 = vunpack.c.l.bf16 %v179_v2  ;;  %v181_v5 = vunpack.c.h.bf16 %v179_v2  ;;  %s310_s3 = smov [#allocation10]  }
  0x2e   :  { %189 = vmatpush3.bf16.msra.mxu0 %v205_v0  ;;  %v184_v6 = vunpack.c.l.bf16 %v183_v3  ;;  %v185_v7 = vunpack.c.h.bf16 %v183_v3  ;;  %s161_s8 = sshll.u32 %s310_s3, 4  ;;  %s162_s8 = int_to_ptr.vmem [resolvable:$true] %s161_s8 }
  0x2f   :  { %s274_s9 = scalar_lea.vmem %s162_s8, 256  ;;  %p279_p2 = scmp.lt.s32.totalorder %s162_s8, %s162_s8 }
  0x30   :  { %p275_p1 = scmp.ne.s32.totalorder %s162_s8, %s274_s9  ;;  %p280_p3 = scmp.lt.s32.totalorder %s274_s9, %s274_s9 }
  0x32   :  { %v84_v8 = vstv %s78_s1  ;;  %p281_p4 = por %p280_p3, %p279_p2 }
  0x33   :  { %v85_v9 = vmul.f32 %v180_v4, %v84_v8  ;;  %v86_v10 = vmul.f32 %v181_v5, %v84_v8  ;;  %v91_v11 = vstv %s175_s7 }
  0x34   :  { %v92_v12 = vmul.f32 %v184_v6, %v91_v11  ;;  %v93_v13 = vmul.f32 %v185_v7, %v91_v11  ;;  %v97_v17 = vld [vmem:[#allocation10] sm:$0xff]  ;;  %v98_v21 = vld [vmem:[#allocation10 + $0x8] sm:$0xff]  ;;  %p282_p5 = pnand %p281_p4, %p275_p1 }
  0x36   :  { %v94_v14 = vadd.f32 %v92_v12, %v85_v9  ;;  %v95_v15 = vadd.f32 %v93_v13, %v86_v10 }
  0x38   :  { %v96_v16 = vpack.c.bf16 %v95_v15, %v94_v14 }
  0x3a   :  { %191 = vmatmul.mubr.msk.bf16.vlgmr.msra.gmra.mxu0 %vm75_vm0, %v96_v16 }
  0xfa   :  { %v145_v18 = vpop.f32.mrf.mxu0 }
  0xfb   :  { %v152_v19 = vadd.f32 %v145_v18, %v97_v17 }
  0xfc   :  { %v192_v20 = vpop.f32.mrf.mxu0 }
  0xfd   :  { %154 = vst.msk [vmem:[#allocation10] sm:$0xff] %vm75_vm0, %v152_v19 }
  0xfe   :  { %v148_v22 = vpop.f32.mrf.mxu0 }
  0xff   :  { %v153_v23 = vadd.f32 %v148_v22, %v98_v21 }
 0x100   :  { %v193_v24 = vpop.f32.mrf.mxu0 }
 0x101   :  { %155 = vst.msk [vmem:[#allocation10 + $0x8] sm:$0xff] %vm75_vm0, %v153_v23 }
 0x102   :  { %285 = shalt.err (!%p282_p5)
}
 0x103   :  { %s311_s10 = smov 128   ;;  %s312_s11 = smov 8  }
 0x104   :  { %167 = dma.vmem_to_hbm [thread:$0]  %s162_s8, 256, %s362_s4, [#allocation4], %s311_s10, %s311_s10, %s312_s11  }
 0x105   :  { %300 = dma.done.wait [#allocation4], 256  }
 0x106   :  { %301 = vsyncadd [#allocation4], 4294967040 }
 0x107   :  { %171 = vsyncpa [#allocation3], 1 }
 0x108   :  { %172 = vsyncpa [#allocation8], 1 }
 0x109   :  { %173 = vsyncpa [#allocation4], 1 }
 0x10a   :  { %174 = vsyncpa [#allocation5], 1 }

</bundles_post_ra>
